<compile_context>
chip_gen: v7x
topology: tpu7x:2x2x1
jax: 0.10.0
libtpu: 0.0.40
codegen_flags: <defaults>
</compile_context>

<pallas_src>
import functools
import math

import jax
import jax.numpy as jnp
from jax.experimental import pallas as pl
from jax.experimental.pallas import tpu as pltpu


# ----------------------------------------------------------------------------
# Tile planning shared by the norm kernels
# ----------------------------------------------------------------------------
def _plan_row_tiles(rows, bytes_per_row, resident_bytes, row_align, tile_rows=None):
    """Pick an aligned row-tile size and an explicit VMEM limit.

    bytes_per_row:   double-buffered per-row VMEM cost of all tiled in/out refs
    resident_bytes:  VMEM cost of per-call resident refs (e.g. weight row)
    """
    try:
        vmem_cap = int(pltpu.get_tpu_info().vmem_capacity_bytes)
    except Exception:
        vmem_cap = 64 * 1024 * 1024                 # v7x-safe fallback
    budget = int(vmem_cap * 0.75)                   # headroom

    max_rows_fit = max(row_align, (budget - resident_bytes) // max(bytes_per_row, 1))

    if tile_rows is None:
        tile_rows = 1024                            # mem-bound sweet spot 256-1024
    tile_rows = min(int(tile_rows), int(max_rows_fit))

    if tile_rows >= rows:
        # Whole problem fits in one tile: split into two aligned tiles when
        # possible so v7x's two TensorCores both get work.
        half = ((rows // 2) // row_align) * row_align
        if rows % row_align == 0 and half >= row_align:
            tile_rows = half
        else:
            tile_rows = rows                        # full extent (always legal)
    else:
        tile_rows = max(row_align, (tile_rows // row_align) * row_align)

    vmem_needed = tile_rows * bytes_per_row + resident_bytes
    vmem_limit = int(min(vmem_cap * 0.9,
                         max(vmem_needed + (4 << 20), 32 << 20)))
    return int(tile_rows), int(vmem_limit)


# ----------------------------------------------------------------------------
# Pallas RMSNorm kernel
# ----------------------------------------------------------------------------
def _rmsnorm_kernel(x_ref, w_ref, o_ref, *, eps, inv_dim, keep_torch_cast):
    # x_ref: (tile_rows, dim) block; w_ref: (1, dim); o_ref: (tile_rows, dim)
    x = x_ref[...].astype(jnp.float32)                      # x.float()
    ms = jnp.sum(x * x, axis=-1, keepdims=True) * inv_dim   # x.pow(2).mean(-1)
    normed = x * jax.lax.rsqrt(ms + eps)                    # * rsqrt(ms + eps)
    if keep_torch_cast and x_ref.dtype != jnp.float32:
        # torch: ._norm(x.float()).type_as(x), then * weight.  Only costs
        # anything for sub-f32 inputs; skipped when it is a no-op.
        normed = normed.astype(x_ref.dtype).astype(jnp.float32)
    o_ref[...] = (normed * w_ref[...].astype(jnp.float32)).astype(o_ref.dtype)


def rmsnorm(x, weight, eps=1e-6, tile_rows=None, exact_torch_cast=True):
    """Pallas RMSNorm.  x: (..., dim), weight: (dim,)."""
    orig_shape = x.shape
    dim = orig_shape[-1]
    rows = int(math.prod(orig_shape[:-1])) if len(orig_shape) > 1 else 1

    # Output dtype mirrors torch promotion of (x-typed output) * weight.
    out_dtype = jnp.result_type(x.dtype, weight.dtype)

    x2d = x.reshape(rows, dim)
    w2d = weight.reshape(1, dim)

    in_b = jnp.dtype(x.dtype).itemsize
    out_b = jnp.dtype(out_dtype).itemsize
    w_b = jnp.dtype(weight.dtype).itemsize
    row_align = max(8, 32 // in_b)                  # sublane packing per dtype

    tile_rows, vmem_limit = _plan_row_tiles(
        rows,
        bytes_per_row=2 * dim * (in_b + out_b),     # double-buffered in + out
        resident_bytes=2 * dim * w_b,               # double-buffered weight row
        row_align=row_align,
        tile_rows=tile_rows,
    )

    grid = (pl.cdiv(rows, tile_rows),)

    out2d = pl.pallas_call(
        functools.partial(
            _rmsnorm_kernel,
            eps=float(eps),
            inv_dim=1.0 / float(dim),
            keep_torch_cast=bool(exact_torch_cast),
        ),
        out_shape=jax.ShapeDtypeStruct((rows, dim), out_dtype),
        grid_spec=pl.GridSpec(
            grid=grid,
            in_specs=[
                pl.BlockSpec((tile_rows, dim), lambda i: (i, 0)),
                pl.BlockSpec((1, dim), lambda i: (0, 0)),
            ],
            out_specs=pl.BlockSpec((tile_rows, dim), lambda i: (i, 0)),
        ),
        compiler_params=pltpu.CompilerParams(
            dimension_semantics=("parallel",),
            vmem_limit_bytes=vmem_limit,
        ),
    )(x2d, w2d)

    return out2d.reshape(orig_shape)


# ----------------------------------------------------------------------------
# Fused residual-add + RMSNorm kernel (h = x + y; normed = RMSNorm(h) * w)
# ----------------------------------------------------------------------------
def _add_rmsnorm_kernel(x_ref, y_ref, w_ref, h_ref, o_ref, *,
                        eps, inv_dim, keep_torch_cast):
    h = x_ref[...] + y_ref[...]                              # residual add
    h_ref[...] = h.astype(h_ref.dtype)
    hf = h.astype(jnp.float32)
    ms = jnp.sum(hf * hf, axis=-1, keepdims=True) * inv_dim
    normed = hf * jax.lax.rsqrt(ms + eps)
    if keep_torch_cast and h_ref.dtype != jnp.float32:
        normed = normed.astype(h_ref.dtype).astype(jnp.float32)
    o_ref[...] = (normed * w_ref[...].astype(jnp.float32)).astype(o_ref.dtype)


def add_rmsnorm(x, y, weight, eps=1e-6, tile_rows=None, exact_torch_cast=True):
    """Fused: h = x + y; normed = RMSNorm(h) * weight.  Returns (h, normed)."""
    orig_shape = x.shape
    dim = orig_shape[-1]
    rows = int(math.prod(orig_shape[:-1])) if len(orig_shape) > 1 else 1

    h_dtype = jnp.result_type(x.dtype, y.dtype)
    out_dtype = jnp.result_type(h_dtype, weight.dtype)

    x2d = x.reshape(rows, dim)
    y2d = y.reshape(rows, dim)
    w2d = weight.reshape(1, dim)

    xb = jnp.dtype(x.dtype).itemsize
    yb = jnp.dtype(y.dtype).itemsize
    hb = jnp.dtype(h_dtype).itemsize
    ob = jnp.dtype(out_dtype).itemsize
    wb = jnp.dtype(weight.dtype).itemsize
    row_align = max(8, 32 // min(xb, yb))

    tile_rows, vmem_limit = _plan_row_tiles(
        rows,
        bytes_per_row=2 * dim * (xb + yb + hb + ob),  # double-buffered 2 in + 2 out
        resident_bytes=2 * dim * wb,
        row_align=row_align,
        tile_rows=tile_rows,
    )

    grid = (pl.cdiv(rows, tile_rows),)

    h2d, o2d = pl.pallas_call(
        functools.partial(
            _add_rmsnorm_kernel,
            eps=float(eps),
            inv_dim=1.0 / float(dim),
            keep_torch_cast=bool(exact_torch_cast),
        ),
        out_shape=(jax.ShapeDtypeStruct((rows, dim), h_dtype),
                   jax.ShapeDtypeStruct((rows, dim), out_dtype)),
        grid_spec=pl.GridSpec(
            grid=grid,
            in_specs=[
                pl.BlockSpec((tile_rows, dim), lambda i: (i, 0)),
                pl.BlockSpec((tile_rows, dim), lambda i: (i, 0)),
                pl.BlockSpec((1, dim), lambda i: (0, 0)),
            ],
            out_specs=(pl.BlockSpec((tile_rows, dim), lambda i: (i, 0)),
                       pl.BlockSpec((tile_rows, dim), lambda i: (i, 0))),
        ),
        compiler_params=pltpu.CompilerParams(
            dimension_semantics=("parallel",),
            vmem_limit_bytes=vmem_limit,
        ),
    )(x2d, y2d, w2d)

    return h2d.reshape(orig_shape), o2d.reshape(orig_shape)


def rmsnorm_reference(x, weight, eps=1e-6):
    xf = x.astype(jnp.float32)
    ms = jnp.mean(xf * xf, axis=-1, keepdims=True)
    normed = (xf * jax.lax.rsqrt(ms + eps)).astype(x.dtype)
    return normed * weight


# ----------------------------------------------------------------------------
# Rotary embeddings
# ----------------------------------------------------------------------------
def apply_scaling(freqs):
    scale_factor = 8.0
    low_freq_factor = 1.0
    high_freq_factor = 4.0
    old_context_len = 8192.0
    low_freq_wavelen = old_context_len / low_freq_factor
    high_freq_wavelen = old_context_len / high_freq_factor
    wavelen = 2.0 * math.pi / freqs
    smooth = (old_context_len / wavelen - low_freq_factor) / (
        high_freq_factor - low_freq_factor)
    scaled = (1.0 - smooth) * freqs / scale_factor + smooth * freqs
    return jnp.where(
        wavelen < high_freq_wavelen, freqs,
        jnp.where(wavelen > low_freq_wavelen, freqs / scale_factor, scaled))


def precompute_freqs_cis(dim, end, theta=10000.0, use_scaled=False):
    freqs = 1.0 / (theta ** (jnp.arange(0, dim, 2)[: dim // 2].astype(jnp.float32) / dim))
    if use_scaled:
        freqs = apply_scaling(freqs)
    t = jnp.arange(end, dtype=jnp.float32)
    freqs = jnp.outer(t, freqs)                       # (end, dim//2)
    return jnp.cos(freqs), jnp.sin(freqs)             # real/imag of polar(1, f)


def apply_rotary_emb(xq, xk, cos, sin):
    # xq: (b, s, h, d); xk: (b, s, h_kv, d); cos/sin: (s, d//2)
    def rot(x):
        xf = x.astype(jnp.float32)
        xr = xf.reshape(*x.shape[:-1], -1, 2)
        x0, x1 = xr[..., 0], xr[..., 1]
        c = cos[None, :, None, :]
        s = sin[None, :, None, :]
        o0 = x0 * c - x1 * s
        o1 = x0 * s + x1 * c
        out = jnp.stack([o0, o1], axis=-1).reshape(x.shape)
        return out.astype(x.dtype)
    return rot(xq), rot(xk)


def repeat_kv(x, n_rep):
    if n_rep == 1:
        return x
    b, s, h, d = x.shape
    return jnp.broadcast_to(
        x[:, :, :, None, :], (b, s, h, n_rep, d)).reshape(b, s, h * n_rep, d)


# ----------------------------------------------------------------------------
# Attention / FeedForward / TransformerBlock / Transformer (plain JAX wrappers)
# ----------------------------------------------------------------------------
def attention_fwd(p, cache, x, start_pos, cos, sin, mask, cfg):
    bsz, seqlen, _ = x.shape
    n_heads, n_kv, head_dim = cfg["n_heads"], cfg["n_kv_heads"], cfg["head_dim"]

    xq = (x @ p["wq"]).reshape(bsz, seqlen, n_heads, head_dim)
    xk = (x @ p["wk"]).reshape(bsz, seqlen, n_kv, head_dim)
    xv = (x @ p["wv"]).reshape(bsz, seqlen, n_kv, head_dim)

    xq, xk = apply_rotary_emb(xq, xk, cos, sin)

    cache_k = jax.lax.dynamic_update_slice(
        cache["k"], xk.astype(cache["k"].dtype), (0, start_pos, 0, 0))
    cache_v = jax.lax.dynamic_update_slice(
        cache["v"], xv.astype(cache["v"].dtype), (0, start_pos, 0, 0))

    keys = cache_k[:bsz, : start_pos + seqlen]
    values = cache_v[:bsz, : start_pos + seqlen]

    n_rep = n_heads // n_kv
    keys = repeat_kv(keys, n_rep)
    values = repeat_kv(values, n_rep)

    xq_t = xq.transpose(0, 2, 1, 3)            # (b, h, q, d)
    keys_t = keys.transpose(0, 2, 1, 3)        # (b, h, k, d)
    values_t = values.transpose(0, 2, 1, 3)    # (b, h, k, d)

    scores = jnp.einsum("bhqd,bhkd->bhqk", xq_t, keys_t) / math.sqrt(head_dim)
    if mask is not None:
        scores = scores + mask
    scores = jax.nn.softmax(scores.astype(jnp.float32), axis=-1).astype(xq.dtype)
    out = jnp.einsum("bhqk,bhkd->bhqd", scores, values_t)
    out = out.transpose(0, 2, 1, 3).reshape(bsz, seqlen, -1)
    return out @ p["wo"], {"k": cache_k, "v": cache_v}


def feed_forward_fwd(p, x):
    return (jax.nn.silu(x @ p["w1"]) * (x @ p["w3"])) @ p["w2"]


def block_fwd(p, cache, x, start_pos, cos, sin, mask, cfg):
    attn_out, cache = attention_fwd(
        p["attention"], cache,
        rmsnorm(x, p["attention_norm"], eps=cfg["norm_eps"]),
        start_pos, cos, sin, mask, cfg)
    # Fused residual add + ffn_norm: one HBM pass instead of two.
    h, h_normed = add_rmsnorm(x, attn_out, p["ffn_norm"], eps=cfg["norm_eps"])
    out = h + feed_forward_fwd(p["feed_forward"], h_normed)
    return out, cache


def transformer_fwd(params, caches, tokens, start_pos, cfg):
    bsz, seqlen = tokens.shape
    h = params["tok_embeddings"][tokens]                       # (b, s, dim)
    cos = cfg["freqs_cos"][start_pos: start_pos + seqlen]
    sin = cfg["freqs_sin"][start_pos: start_pos + seqlen]

    mask = None
    if seqlen > 1:
        mask = jnp.full((seqlen, seqlen), float("-inf"), dtype=h.dtype)
        mask = jnp.triu(mask, k=1)
        mask = jnp.concatenate(
            [jnp.zeros((seqlen, start_pos), dtype=h.dtype), mask], axis=1)

    new_caches = []
    for layer_p, cache in zip(params["layers"], caches):
        h, cache = block_fwd(layer_p, cache, h, start_pos, cos, sin, mask, cfg)
        new_caches.append(cache)

    h = rmsnorm(h, params["norm"], eps=cfg["norm_eps"])
    logits = (h @ params["output"]).astype(jnp.float32)
    return logits, new_caches


# ----------------------------------------------------------------------------
# Config / init
# ----------------------------------------------------------------------------
def make_config():
    dim, n_layers, n_heads, n_kv_heads = 32, 2, 4, 2
    vocab_size, max_seq_len, max_batch_size = 64, 16, 2
    multiple_of = 8
    head_dim = dim // n_heads
    hidden_dim = 4 * dim
    hidden_dim = int(2 * hidden_dim / 3)
    hidden_dim = multiple_of * ((hidden_dim + multiple_of - 1) // multiple_of)
    cos, sin = precompute_freqs_cis(head_dim, max_seq_len * 2,
                                    theta=10000.0, use_scaled=False)
    return dict(dim=dim, n_layers=n_layers, n_heads=n_heads,
                n_kv_heads=n_kv_heads, head_dim=head_dim,
                vocab_size=vocab_size, max_seq_len=max_seq_len,
                max_batch_size=max_batch_size, ffn_hidden_dim=hidden_dim,
                norm_eps=1e-6, freqs_cos=cos, freqs_sin=sin)


def init_transformer_params(key, cfg):
    dim, n_heads, n_kv = cfg["dim"], cfg["n_heads"], cfg["n_kv_heads"]
    head_dim, vocab, hidden = cfg["head_dim"], cfg["vocab_size"], cfg["ffn_hidden_dim"]

    def dense(k, shape, scale=0.02):
        return scale * jax.random.normal(k, shape, dtype=jnp.float32)

    keys = jax.random.split(key, 2 + cfg["n_layers"])
    params = {
        "tok_embeddings": dense(keys[0], (vocab, dim)),
        "norm": jnp.ones((dim,), jnp.float32),
        "output": dense(keys[1], (dim, vocab)),
        "layers": [],
    }
    for l in range(cfg["n_layers"]):
        lk = jax.random.split(keys[2 + l], 7)
        params["layers"].append({
            "attention": {
                "wq": dense(lk[0], (dim, n_heads * head_dim)),
                "wk": dense(lk[1], (dim, n_kv * head_dim)),
                "wv": dense(lk[2], (dim, n_kv * head_dim)),
                "wo": dense(lk[3], (n_heads * head_dim, dim)),
            },
            "feed_forward": {
                "w1": dense(lk[4], (dim, hidden)),
                "w2": dense(lk[5], (hidden, dim)),
                "w3": dense(lk[6], (dim, hidden)),
            },
            "attention_norm": jnp.ones((dim,), jnp.float32),
            "ffn_norm": jnp.ones((dim,), jnp.float32),
        })
    return params


def init_caches(cfg):
    shape = (cfg["max_batch_size"], cfg["max_seq_len"],
             cfg["n_kv_heads"], cfg["head_dim"])
    return [{"k": jnp.zeros(shape, jnp.float32),
             "v": jnp.zeros(shape, jnp.float32)}
            for _ in range(cfg["n_layers"])]


# ----------------------------------------------------------------------------
# Self-test
# ----------------------------------------------------------------------------
if __name__ == "__main__":
    key = jax.random.PRNGKey(0)
    k1, k2, k3, k4, k5, k6, k7 = jax.random.split(key, 7)

    # 1) Pallas RMSNorm correctness — small dim (full-extent block) path.
    x = jax.random.normal(k1, (2, 8, 32), dtype=jnp.float32)
    w = jnp.ones((32,), dtype=jnp.float32)
    out = jax.block_until_ready(rmsnorm(x, w, eps=1e-6))
    ref = rmsnorm_reference(x, w, eps=1e-6)
    assert out.shape == x.shape, (out.shape, x.shape)
    assert jnp.allclose(out, ref, atol=1e-5, rtol=1e-5), "rmsnorm f32 mismatch"

    # 2) Lane-dense dim (multiple of 128) + split grid path.
    x2 = jax.random.normal(k2, (4, 8, 256), dtype=jnp.float32)
    w2 = 1.0 + 0.1 * jax.random.normal(k3, (256,), dtype=jnp.float32)
    out2 = jax.block_until_ready(rmsnorm(x2, w2, eps=1e-6))
    ref2 = rmsnorm_reference(x2, w2, eps=1e-6)
    assert jnp.allclose(out2, ref2, atol=1e-5, rtol=1e-5), "rmsnorm f32/256 mismatch"

    # 3) bf16 input, torch-faithful intermediate downcast path.
    xb = jax.random.normal(k4, (2, 8, 256), dtype=jnp.float32).astype(jnp.bfloat16)
    outb = jax.block_until_ready(rmsnorm(xb, w2, eps=1e-6, exact_torch_cast=True))
    refb = rmsnorm_reference(xb, w2, eps=1e-6)
    assert outb.dtype == refb.dtype, (outb.dtype, refb.dtype)
    assert jnp.allclose(outb.astype(jnp.float32), refb.astype(jnp.float32),
                        atol=1e-2, rtol=1e-2), "rmsnorm bf16 mismatch"

    # 4) Fused residual-add + RMSNorm kernel.
    xa = jax.random.normal(k5, (2, 8, 256), dtype=jnp.float32)
    ya = jax.random.normal(k6, (2, 8, 256), dtype=jnp.float32)
    h_f, n_f = add_rmsnorm(xa, ya, w2, eps=1e-6)
    h_f = jax.block_until_ready(h_f)
    assert jnp.allclose(h_f, xa + ya, atol=1e-6, rtol=1e-6), "fused add mismatch"
    assert jnp.allclose(n_f, rmsnorm_reference(xa + ya, w2, eps=1e-6),
                        atol=1e-5, rtol=1e-5), "fused norm mismatch"

    # 5) Full Llama-style Transformer forward using the Pallas norms.
    cfg = make_config()
    params = init_transformer_params(k7, cfg)
    caches = init_caches(cfg)
    tokens = jax.random.randint(k1, (2, 8), 0, cfg["vocab_size"])
    logits, caches = transformer_fwd(params, caches, tokens, start_pos=0, cfg=cfg)
    logits = jax.block_until_ready(logits)
    assert logits.shape == (2, 8, cfg["vocab_size"]), logits.shape
    assert bool(jnp.all(jnp.isfinite(logits))), "non-finite logits"

    print("KERNEL_OK")
</pallas_src>

<mosaic_0001>
module attributes {stable_mosaic.version = 11 : i64} {
  func.func @_rmsnorm_kernel(%arg0: i32, %arg1: memref<8x32xf32, #tpu.memory_space<vmem>>, %arg2: memref<1x32xf32, #tpu.memory_space<vmem>>, %arg3: memref<8x32xf32, #tpu.memory_space<vmem>>) attributes {dimension_semantics = [#tpu.dimension_semantics<parallel>], iteration_bounds = array<i64: 2>, scalar_prefetch = 0 : i64, scratch_operands = 0 : i64, tpu.core_type = #tpu.core_type<tc>, window_params = [{transform_indices = @transform_0, window_bounds = array<i64: 8, 32>}, {pipeline_mode = #tpu.pipeline_mode<synchronous>, transform_indices = @transform_1, window_bounds = array<i64: 1, 32>}, {transform_indices = @transform_2, window_bounds = array<i64: 8, 32>}]} {
    %c0 = arith.constant 0 : index
    %c0_0 = arith.constant 0 : index
    %0 = vector.load %arg1[%c0, %c0_0] : memref<8x32xf32, #tpu.memory_space<vmem>>, vector<8x32xf32>
    %1 = arith.mulf %0, %0 : vector<8x32xf32>
    %cst = arith.constant dense<0.000000e+00> : vector<8xf32>
    %2 = vector.multi_reduction <add>, %1, %cst [1] : vector<8x32xf32> to vector<8xf32>
    %3 = vector.shape_cast %2 : vector<8xf32> to vector<8x1xf32>
    %cst_1 = arith.constant 3.125000e-02 : f32
    %4 = vector.broadcast %cst_1 : f32 to vector<8x1xf32>
    %5 = arith.mulf %3, %4 : vector<8x1xf32>
    %cst_2 = arith.constant 9.99999997E-7 : f32
    %6 = vector.broadcast %cst_2 : f32 to vector<8x1xf32>
    %7 = arith.addf %5, %6 : vector<8x1xf32>
    %8 = math.rsqrt %7 : vector<8x1xf32>
    %9 = vector.broadcast %8 : vector<8x1xf32> to vector<8x32xf32>
    %10 = arith.mulf %0, %9 : vector<8x32xf32>
    %c0_3 = arith.constant 0 : index
    %c0_4 = arith.constant 0 : index
    %11 = vector.load %arg2[%c0_3, %c0_4] : memref<1x32xf32, #tpu.memory_space<vmem>>, vector<1x32xf32>
    %12 = vector.broadcast %11 : vector<1x32xf32> to vector<8x32xf32>
    %13 = arith.mulf %10, %12 : vector<8x32xf32>
    %c0_5 = arith.constant 0 : index
    %c0_6 = arith.constant 0 : index
    %14 = vector.load %arg3[%c0_5, %c0_6] : memref<8x32xf32, #tpu.memory_space<vmem>>, vector<8x32xf32>
    tpu.vector_store %arg3[%c0_5, %c0_6], %13 {strides = array<i32>} : memref<8x32xf32, #tpu.memory_space<vmem>>, vector<8x32xf32>,
    return
  }
  func.func @transform_0(%arg0: i32) -> (i32, i32) {
    %c0_i32 = arith.constant 0 : i32
    %c0_i32_0 = arith.constant 0 : i32
    return %arg0, %c0_i32 : i32, i32
  }
  func.func @transform_1(%arg0: i32) -> (i32, i32) {
    %c0_i32 = arith.constant 0 : i32
    %c0_i32_0 = arith.constant 0 : i32
    %c0_i32_1 = arith.constant 0 : i32
    return %c0_i32, %c0_i32_0 : i32, i32
  }
  func.func @transform_2(%arg0: i32) -> (i32, i32) {
    %c0_i32 = arith.constant 0 : i32
    %c0_i32_0 = arith.constant 0 : i32
    return %arg0, %c0_i32 : i32, i32
  }
}

</mosaic_0001>

<bundles_post_ra>
// kernel: tpu_custom_call.1
= control target key start
LH: loop header
LB: loop body
LE: loop exit
PB: predicated region body
PF: predicated region fallthrough
CT: control target
= control target key end

     0   :  { %7 = vsyncpa [#allocation3], 0  ;;  %s604_s0 = inlined_call_operand.hbm [shape: f32[16,32], index: 0, kind: input, shape index: {}]   ;;  %s605_s1 = inlined_call_operand.vmem [shape: f32[1,32], index: 1, kind: input, shape index: {}]   ;;  %s606_s2 = inlined_call_operand.hbm [shape: f32[16,32], index: 2, kind: output, shape index: {}]  }
   0x1   :  { %9 = vsyncpa [#allocation3 + $0x1], 0 }
   0x2   :  { %10 = vsyncpa [#allocation4], 0 }
   0x3   :  { %12 = vsyncpa [#allocation4 + $0x1], 0  ;;  %s438_s9 = smov 0   ;;  %s440_s10 = smov 0  }
   0x4   :  { %s442_s11 = smov 0   ;;  %s444_s12 = smov 0  }
   0x5 LB: > { %s459_s13 = sadd.s32 4294967295, %s419_s12   ;;  %s262_s14 = sadd.s32 4294967294, %s419_s12   ;;  %s419_s12 = sphi %s444_s12, %s621_s12   ;;  %s415_s11 = sphi %s442_s11, %s620_s11   ;;  %s411_s10 = sphi %s440_s10, %s619_s10   ;;  %s407_s9 = sphi %s438_s9, %s618_s9  }
   0x6   : > { %s463_s15 = sadd.s32 1, %s419_s12   ;;  %s25_s16 = sadd.s32 1, %s415_s11 }
   0x7   : > { %s22_s17 = ssub.s32 %s419_s12, %s463_s15  ;;  %p32_p0 = scmp.ne.s32.totalorder %s415_s11, %s411_s10 }
   0x8   : > { %p23_p1 = scmp.eq.s32.totalorder %s22_s17, 0  ;;  %p33_p2 = scmp.eq.s32.totalorder %s419_s12, 0 }
   0x9   : > { %p38_p3 = scmp.ne.s32.totalorder %s411_s10, %s407_s9  ;;  %p39_p4 = scmp.eq.s32.totalorder %s459_s13, 0 }
   0xa   : > { %s475_s18 = scalar_select %p23_p1, %s415_s11, %s25_s16  }
   0xb   : > { %p477_p5 = por %p33_p2, %p32_p0  ;;  %p481_p6 = por %p39_p4, %p38_p3 }
   0xc   : > { %p83_p7 = scmp.eq.s32.totalorder %s459_s13, 1  ;;  %p89_p8 = scmp.eq.s32.totalorder %s262_s14, 1 }
   0xd   : > { %p287_p10 = scmp.lt.s32.totalorder %s419_s12, 2  ;;  %s112_s23 = sand.u32 1, %s415_s11  }
   0xe   : > { %p488_p11 = por %p83_p7, %p32_p0  ;;  %p492_p12 = por %p89_p8, %p38_p3 }
   0xf   : > { %s266_s24 = sshll.u32 %s419_s12, 7  ;;  %s265_s25 = sshll.u32 %s112_s23, 3 }
  0x10   : > { %s610_s21 = scalar_select %p488_p11, 1, 0 }
  0x11   : > { %s611_s22 = scalar_select %p492_p12, 1, 0 }
  0x12   : > { %s501_s28 = scalar_lea.hbm %s604_s0, %s266_s24  ;;  %s116_s29 = scalar_lea.vmem [#allocation2], %s265_s25 }
  0x13   : > { %s123_s30 = sshll.u32 %s116_s29, 4  ;;  %p505_p13 = pnand %p287_p10, %p477_p5  ;;  %s509_s30 = int_to_ptr.vmem [resolvable:$true] %s123_s30 }
  0x14   : > { %s113_s4 = scalar_lea.sflag [#allocation3], %s112_s23  ;;  %s323_s5 = scalar_lea.hbm %s501_s28, 128 }
  0x15   : > { %p324_p2 = scmp.ne.s32.totalorder %s501_s28, %s323_s5  ;;  %p325_p3 = pneg %p505_p13 }
  0x16   : > { %s328_s8 = scalar_lea.hbm %s604_s0, 256  ;;  %p329_p5 = scmp.lt.u32.totalorder %s501_s28, %s604_s0 }
  0x17   : > { %p326_p4 = pnand %p325_p3, %p324_p2  ;;  %p330_p8 = scmp.lt.u32.totalorder %s328_s8, %s323_s5 }
  0x18   : > { %p332_p9 = scmp.lt.u32.totalorder %s323_s5, %s501_s28 }
  0x19   : > { %p327_p7 = pneg %p326_p4  ;;  %p331_p10 = por %p330_p8, %p329_p5 }
  0x1b   : > { %p333_p0 = por %p332_p9, %p331_p10 }
  0x1d   : > { %p334_p1 = pnand %p333_p0, %p327_p7 }
  0x1f   : > { %337 = shalt.err (!%p334_p1)
}
  0x20   : > { %s338_s17 = scalar_lea.vmem %s509_s30, 128  ;;  %s421_s19 = smov [#allocation2]  }
  0x21   : > { %p339_p2 = scmp.ne.s32.totalorder %s509_s30, %s338_s17  ;;  %s343_s23 = sshll.u32 %s421_s19, 4  ;;  %s344_s23 = int_to_ptr.vmem [resolvable:$false] %s343_s23 }
  0x22   : > { %s345_s24 = scalar_lea.vmem %s344_s23, 256  ;;  %p346_p11 = scmp.lt.s32.totalorder %s509_s30, %s344_s23 }
  0x23   : > { %p341_p4 = pnand %p339_p2, %p325_p3  ;;  %p347_p5 = scmp.lt.s32.totalorder %s345_s24, %s338_s17 }
  0x25   : > { %p342_p12 = pneg %p341_p4  ;;  %p348_p8 = por %p347_p5, %p346_p11 }
  0x27   : > { %p349_p9 = pnand %p348_p8, %p342_p12 }
  0x29   : > { %352 = shalt.err (!%p349_p9)
}
  0x2a   : > { %282 = dma.hbm_to_vmem [thread:$0]  (!%p505_p13), %s501_s28, 128, %s509_s30, %s113_s4  }
  0x2b   : > { %p613_p0 = scmp.lt.s32.totalorder %s419_s12, 3  ;;  %p614_p1 = scmp.ge.s32.totalorder %s419_s12, 1 }
  0x2d   : > { %p129_p3 = pnand %p614_p1, %p613_p0 }
  0x2e   : > { %s543_s25 = sand.u32 (!%p129_p3), 1, %s411_s10  }
  0x2f   : > { %132 = sbr.rel (%p129_p3) target bundleno = 234 (0xea), region = 28  ;;  %s268_s26 = sshll.u32 (!%p129_p3), %s543_s25, 3 }
  0x30   : > { %s135_s27 = scalar_lea.sflag (!%p129_p3), [#allocation3], %s543_s25  ;;  %s138_s29 = scalar_lea.vmem (!%p129_p3), [#allocation2], %s268_s26 }
  0x36   : > { %398 = dma.done.wait (%p481_p6), %s135_s27, 128  }
  0x37   : > { %400 = vsyncadd (%p481_p6), %s135_s27, 4294967168  ;;  %v159_v0 = vld [vmem:[%s138_s29] sm:$0xff]  ;;  %vm161_vm0 = vcmask 261120   ;;  %s272_s20 = sshll.u32 %s459_s13, 7  ;;  %s158_s3 = scalar_lea.vmem [#allocation5], %s268_s26 }
  0x38   : > { %v160_v1 = vmul.f32 %v159_v0, %v159_v0  ;;  %v270_v7 = vld [vmem:[%s605_s1] ss:$0 sm:$0xff]  ;;  %s192_s4 = sshll.u32 %s158_s3, 4  ;;  %s559_s7 = scalar_lea.hbm %s606_s2, %s272_s20  ;;  %s561_s4 = int_to_ptr.vmem [resolvable:$true] %s192_s4 }
  0x39   : > { %s179_s8 = scalar_lea.sflag [#allocation4], %s543_s25  ;;  %s353_s14 = scalar_lea.vmem %s561_s4, 128 }
  0x3a   : > { %v162_v2 = vsel %vm161_vm0, %v160_v1, 0.0  ;;  %p354_p6 = scmp.ne.s32.totalorder %s561_s4, %s353_s14  ;;  %p615_p11 = scmp.ne.s32.totalorder %s610_s21, 0 }
  0x3b   : > { %163 = vadd.xlane.f32.xlu0 %v162_v2  ;;  %s422_s13 = smov [#allocation5]  }
  0x3c   : > { %p355_p12 = pnand %p354_p6, %p615_p11  ;;  %s357_s16 = sshll.u32 %s422_s13, 4  ;;  %s358_s16 = int_to_ptr.vmem [resolvable:$false] %s357_s16 }
  0x3d   : > { %s359_s17 = scalar_lea.vmem %s358_s16, 256  ;;  %p360_p7 = scmp.lt.s32.totalorder %s561_s4, %s358_s16 }
  0x3e   : > { %p356_p13 = pneg %p355_p12  ;;  %p361_p10 = scmp.lt.s32.totalorder %s359_s17, %s353_s14 }
  0x40   : > { %p362_p2 = por %p361_p10, %p360_p7 }
  0x42   : > { %p363_p4 = pnand %p362_p2, %p356_p13 }
  0xc8   : > { %v164_v3 = vpop.xlane.xlu0 %163 }
  0xc9   : > { %v165_v4 = vmul.f32 0.03125, %v164_v3 }
  0xcb   : > { %v166_v5 = vadd.f32 1e-06, %v165_v4 }
  0xcd   : > { %321 = vrsqrt.f32 %v166_v5 }
  0xd7   : > { %v322_v6 = vpop.eup %321 }
  0xd8   : > { %v168_v8 = vmul.f32 %v322_v6, %v159_v0 }
  0xda   : > { %v176_v9 = vmul.f32 %v270_v7, %v168_v8 }
  0xdc   : > { %177 = vst.msk [vmem:[%s158_s3] sm:$0xff] %vm161_vm0, %v176_v9 }
  0xdd   : > { %366 = shalt.err (!%p363_p4)
}
  0xde   : > { %s367_s19 = scalar_lea.hbm %s559_s7, 128  ;;  %s371_s25 = scalar_lea.hbm %s606_s2, 256 }
  0xdf   : > { %p368_p5 = scmp.ne.s32.totalorder %s559_s7, %s367_s19  ;;  %p372_p0 = scmp.lt.u32.totalorder %s559_s7, %s606_s2 }
  0xe0   : > { %p373_p1 = scmp.lt.u32.totalorder %s371_s25, %s367_s19  ;;  %p375_p6 = scmp.lt.u32.totalorder %s367_s19, %s559_s7 }
  0xe1   : > { %p369_p8 = pnand %p368_p5, %p615_p11 }
  0xe2   : > { %p374_p3 = por %p373_p1, %p372_p0 }
  0xe3   : > { %p370_p9 = pneg %p369_p8 }
  0xe4   : > { %p376_p12 = por %p375_p6, %p374_p3 }
  0xe6   : > { %p377_p13 = pnand %p376_p12, %p370_p9 }
  0xe8   : > { %380 = shalt.err (!%p377_p13)
}
  0xe9   : > { %277 = dma.vmem_to_hbm [thread:$0]  (%p615_p11), %s561_s4, 128, %s559_s7, %s179_s8  }
  0xea PF: > { %s204_s29 = sand.u32 1, %s407_s9   ;;  %p616_p7 = scmp.ne.s32.totalorder %s611_s22, 0 }
  0xeb   : > { %p617_p10 = scmp.ge.s32.totalorder %s419_s12, 2  ;;  %s205_s28 = scalar_lea.sflag [#allocation4], %s204_s29 }
  0xed   : > { %p284_p2 = pnand %p617_p10, %p616_p7 }
  0xef   : > { %402 = dma.done.wait (!%p284_p2), %s205_s28, 128  }
  0xf0   : > { %404 = vsyncadd (!%p284_p2), %s205_s28, 4294967168  ;;  %p15_p4 = scmp.ge.s32.totalorder %s463_s15, 4   ;;  %s618_s9 = smov %s411_s10 }
  0xf1   : > { %s619_s10 = smov %s415_s11  ;;  %s620_s11 = smov %s475_s18 }
  0xf2   : > { %s621_s12 = smov %s463_s15  ;;  %17 = sbr.rel (!%p15_p4) target bundleno = 5 (0x5), region = 73 }
  0xf9   :  { %210 = vsyncpa [#allocation3], 1 }
  0xfa   :  { %212 = vsyncpa [#allocation3 + $0x1], 1 }
  0xfb   :  { %213 = vsyncpa [#allocation4], 1 }
  0xfc   :  { %215 = vsyncpa [#allocation4 + $0x1], 1 }

</bundles_post_ra>
